<compile_context>
chip_gen: v7x
topology: tpu7x:2x2x1
jax: 0.10.0
libtpu: 0.0.40
codegen_flags: <defaults>
</compile_context>

<pallas_src>
import functools

import jax
import jax.numpy as jnp
from jax.experimental import pallas as pl
from jax.experimental.pallas import tpu as pltpu

H1, H2, H3 = 512, 256, 128
LEAKY_SLOPE = 0.2   # NOTE: max-based LeakyReLU below requires slope >= 0.


def _round_up(n, m):
    return ((n + m - 1) // m) * m


def _default_fast_epilogue():
    """bf16 epilogue + MXU tail on v6e/v7x; f32 epilogue + VPU/XLU tail on v5e
    and older (no bf16 VALU there, and their MXU is the binding unit anyway).
    Either path is numerically valid on any TPU -- this only affects speed."""
    kind = jax.devices()[0].device_kind.lower()
    return not any(v in kind for v in ("v2", "v3", "v4", "v5"))


def discriminator_kernel(xc_ref, w1_ref, b1_ref, w2_ref, b2_ref,
                         w3_ref, b3_ref, w4_ref, b4_ref, o_ref,
                         *, fast_epilogue):
    slope = LEAKY_SLOPE

    def layer(h_in, w_ref, b_ref):
        # MXU pass, f32 accumulation.
        acc = jnp.dot(h_in, w_ref[...], preferred_element_type=jnp.float32)
        if fast_epilogue:
            # bf16 bias add + LeakyReLU; result feeds the next matmul directly.
            h = acc.astype(jnp.bfloat16) + b_ref[...]
            return jnp.maximum(h, slope * h)          # == LeakyReLU for slope in [0,1)
        # v5e path: f32 epilogue, cast once for the next MXU pass.
        h = acc + b_ref[...]
        h = jnp.maximum(h, slope * h)
        return h.astype(jnp.bfloat16)

    h = layer(xc_ref[...], w1_ref, b1_ref)    # Linear(f_pad, 512) + LeakyReLU (fused concat)
    h = layer(h, w2_ref, b2_ref)              # Linear(512, 256)  + LeakyReLU
    h = layer(h, w3_ref, b3_ref)              # Linear(256, 128)  + LeakyReLU

    if fast_epilogue:
        # Layer 4 on the MXU (idle cycles on v6e/v7x): (TB,128) x (128,1), f32 acc.
        out = jnp.dot(h, w4_ref[...], preferred_element_type=jnp.float32) + b4_ref[...]
    else:
        # v5e: keep layer 4 off the (bottleneck) MXU -> VPU multiply + XLU lane reduce.
        out = jnp.sum(h * w4_ref[...], axis=-1, keepdims=True) + b4_ref[...]
    o_ref[...] = out.astype(o_ref.dtype)


def discriminator_forward(x, c, params, tb=1024, fast_epilogue=None):
    """Batch-tiled Pallas forward.  Weights stay VMEM-resident across the grid."""
    if fast_epilogue is None:
        fast_epilogue = _default_fast_epilogue()

    B = x.shape[0]
    f_in = x.shape[1] + c.shape[1]
    f_pad = _round_up(f_in, 128)          # lane-dense layer-1 LHS / w1

    # --- batch tile selection -------------------------------------------------
    #  * multiple of 16 (bf16 sublane packing)
    #  * >= 2 grid steps when possible so ("parallel",) shards across 2 TCs (v7x)
    #  * bounded zero-row padding (no ~2x blow-up when B is just above tb)
    B16 = _round_up(max(B, 1), 16)
    n_tiles = pl.cdiv(B16, tb)
    if n_tiles == 1 and B16 >= 32:
        n_tiles = 2
    TB = _round_up(pl.cdiv(B16, n_tiles), 16)
    n_tiles = pl.cdiv(B16, TB)
    B_pad = TB * n_tiles

    # Fuse concat + bf16 cast + (batch, feature) zero-pad in the wrapper (free XLA ops).
    xc = jnp.concatenate([x, c], axis=1).astype(jnp.bfloat16)
    xc = jnp.pad(xc, ((0, B_pad - B), (0, f_pad - f_in)))

    # Weights / biases, laid out for the chosen path.
    w1 = jnp.pad(params["w1"], ((0, f_pad - f_in), (0, 0)))       # (f_pad, H1) bf16, zero rows
    w2, w3 = params["w2"], params["w3"]                           # bf16
    if fast_epilogue:
        b1 = params["b1"].astype(jnp.bfloat16)
        b2 = params["b2"].astype(jnp.bfloat16)
        b3 = params["b3"].astype(jnp.bfloat16)
        w4 = params["w4"].reshape(H3, 1).astype(jnp.bfloat16)     # MXU column
    else:
        b1, b2, b3 = params["b1"], params["b2"], params["b3"]     # f32
        w4 = params["w4"].reshape(1, H3)                          # f32 row for VPU path
    b4 = params["b4"]                                             # (1, 1) f32

    const = lambda i: (0, 0)       # resident weights / biases (DMA'd once)
    batch = lambda i: (i, 0)       # batch-tiled input / output

    flops = 2 * B_pad * (f_pad * H1 + H1 * H2 + H2 * H3 + H3 * 1)
    bytes_accessed = (
        xc.size * 2
        + (f_pad * H1 + H1 * H2 + H2 * H3) * 2                    # bf16 weights
        + (H1 + H2 + H3 + H3) * (2 if fast_epilogue else 4)       # biases + w4
        + B_pad * 4 + 4                                           # f32 output + b4
    )

    out = pl.pallas_call(
        functools.partial(discriminator_kernel, fast_epilogue=fast_epilogue),
        out_shape=jax.ShapeDtypeStruct((B_pad, 1), jnp.float32),
        grid_spec=pltpu.PrefetchScalarGridSpec(
            num_scalar_prefetch=0,
            grid=(n_tiles,),
            in_specs=[
                pl.BlockSpec((TB, f_pad), batch),     # xc (bf16, lane-dense)
                pl.BlockSpec((f_pad, H1), const),     # w1 (bf16)
                pl.BlockSpec((1, H1), const),         # b1
                pl.BlockSpec((H1, H2), const),        # w2 (bf16)
                pl.BlockSpec((1, H2), const),         # b2
                pl.BlockSpec((H2, H3), const),        # w3 (bf16)
                pl.BlockSpec((1, H3), const),         # b3
                pl.BlockSpec(w4.shape, const),        # w4 ((H3,1) bf16 or (1,H3) f32)
                pl.BlockSpec((1, 1), const),          # b4 (f32)
            ],
            out_specs=pl.BlockSpec((TB, 1), batch),
        ),
        compiler_params=pltpu.CompilerParams(
            dimension_semantics=("parallel",)),
        cost_estimate=pl.CostEstimate(
            flops=flops, transcendentals=0, bytes_accessed=bytes_accessed),
    )(xc, w1, b1, w2, b2, w3, b3, w4, b4)

    return out[:B]


def init_params(key, input_size, condition_size):
    """PyTorch-Linear-style init (uniform +/- 1/sqrt(fan_in)).

    Weights stored transposed (fan_in, fan_out); w1/w2/w3 in bf16 for the MXU,
    w4 as a (1, 128) f32 row (reshaped/cast per path in the wrapper), biases f32."""
    dims = [(input_size + condition_size, H1), (H1, H2), (H2, H3), (H3, 1)]
    keys = jax.random.split(key, 2 * len(dims))
    params = {}
    for i, (fin, fout) in enumerate(dims):
        bound = 1.0 / jnp.sqrt(jnp.float32(fin))
        w = jax.random.uniform(keys[2 * i], (fin, fout), jnp.float32, -bound, bound)
        b = jax.random.uniform(keys[2 * i + 1], (1, fout), jnp.float32, -bound, bound)
        if i < 3:
            params[f"w{i + 1}"] = w.astype(jnp.bfloat16)
            params[f"b{i + 1}"] = b
        else:
            params["w4"] = w.T          # (1, 128) f32 row
            params["b4"] = b            # (1, 1) f32
    return params


def reference_forward(x, c, params, fast_epilogue=None):
    """Pure-JAX reference replicating the kernel's numerics (bf16 matmuls, f32 acc,
    same epilogue dtype / layer-4 path as the kernel)."""
    if fast_epilogue is None:
        fast_epilogue = _default_fast_epilogue()
    slope = LEAKY_SLOPE
    xc = jnp.concatenate([x, c], axis=1).astype(jnp.bfloat16)

    def layer(h, w, b):
        acc = jnp.dot(h, w, preferred_element_type=jnp.float32)
        if fast_epilogue:
            hb = acc.astype(jnp.bfloat16) + b.astype(jnp.bfloat16)
            return jnp.maximum(hb, slope * hb)
        hb = acc + b
        hb = jnp.maximum(hb, slope * hb)
        return hb.astype(jnp.bfloat16)

    h = layer(xc, params["w1"], params["b1"])
    h = layer(h, params["w2"], params["b2"])
    h = layer(h, params["w3"], params["b3"])
    if fast_epilogue:
        return jnp.dot(h, params["w4"].reshape(-1, 1).astype(jnp.bfloat16),
                       preferred_element_type=jnp.float32) + params["b4"]
    return jnp.sum(h * params["w4"], axis=-1, keepdims=True) + params["b4"]


if __name__ == "__main__":
    B = 2
    input_size = 64
    condition_size = 16

    key = jax.random.PRNGKey(0)
    kx, kc, kp = jax.random.split(key, 3)
    x = jax.random.normal(kx, (B, input_size), jnp.float32)
    c = jax.random.normal(kc, (B, condition_size), jnp.float32)
    params = init_params(kp, input_size, condition_size)

    out = jax.block_until_ready(discriminator_forward(x, c, params))
    ref = jax.block_until_ready(reference_forward(x, c, params))

    assert out.shape == (B, 1), out.shape
    assert jnp.allclose(out, ref, atol=5e-3, rtol=5e-3), (out, ref)
    print("KERNEL_OK")
</pallas_src>

<mosaic_0001>
module attributes {stable_mosaic.version = 11 : i64} {
  func.func @discriminator_kernel(%arg0: i32, %arg1: memref<16x128xbf16, #tpu.memory_space<vmem>>, %arg2: memref<128x512xbf16, #tpu.memory_space<vmem>>, %arg3: memref<1x512xbf16, #tpu.memory_space<vmem>>, %arg4: memref<512x256xbf16, #tpu.memory_space<vmem>>, %arg5: memref<1x256xbf16, #tpu.memory_space<vmem>>, %arg6: memref<256x128xbf16, #tpu.memory_space<vmem>>, %arg7: memref<1x128xbf16, #tpu.memory_space<vmem>>, %arg8: memref<128x1xbf16, #tpu.memory_space<vmem>>, %arg9: memref<1x1xf32, #tpu.memory_space<vmem>>, %arg10: memref<16x1xf32, #tpu.memory_space<vmem>>) attributes {dimension_semantics = [#tpu.dimension_semantics<parallel>], iteration_bounds = array<i64: 1>, scalar_prefetch = 0 : i64, scratch_operands = 0 : i64, tpu.core_type = #tpu.core_type<tc>, window_params = [{transform_indices = @transform_0, window_bounds = array<i64: 16, 128>}, {pipeline_mode = #tpu.pipeline_mode<synchronous>, transform_indices = @transform_1, window_bounds = array<i64: 128, 512>}, {pipeline_mode = #tpu.pipeline_mode<synchronous>, transform_indices = @transform_2, window_bounds = array<i64: 1, 512>}, {pipeline_mode = #tpu.pipeline_mode<synchronous>, transform_indices = @transform_3, window_bounds = array<i64: 512, 256>}, {pipeline_mode = #tpu.pipeline_mode<synchronous>, transform_indices = @transform_4, window_bounds = array<i64: 1, 256>}, {pipeline_mode = #tpu.pipeline_mode<synchronous>, transform_indices = @transform_5, window_bounds = array<i64: 256, 128>}, {pipeline_mode = #tpu.pipeline_mode<synchronous>, transform_indices = @transform_6, window_bounds = array<i64: 1, 128>}, {pipeline_mode = #tpu.pipeline_mode<synchronous>, transform_indices = @transform_7, window_bounds = array<i64: 128, 1>}, {pipeline_mode = #tpu.pipeline_mode<synchronous>, transform_indices = @transform_8, window_bounds = array<i64: 1, 1>}, {transform_indices = @transform_9, window_bounds = array<i64: 16, 1>}]} {
    %c0 = arith.constant 0 : index
    %c0_0 = arith.constant 0 : index
    %0 = vector.load %arg1[%c0, %c0_0] : memref<16x128xbf16, #tpu.memory_space<vmem>>, vector<16x128xbf16>
    %c0_1 = arith.constant 0 : index
    %c0_2 = arith.constant 0 : index
    %1 = vector.load %arg2[%c0_1, %c0_2] : memref<128x512xbf16, #tpu.memory_space<vmem>>, vector<128x512xbf16>
    %cst = arith.constant dense<0.000000e+00> : vector<16x512xf32>
    %2 = tpu.matmul %0, %1, %cst {dimension_numbers = #tpu.dot_dimension_numbers<[1], [0], [0], [1], [0, 0, 1, 1], [], []>} : vector<16x128xbf16>, vector<128x512xbf16>, vector<16x512xf32> -> vector<16x512xf32>
    %3 = arith.truncf %2 : vector<16x512xf32> to vector<16x512xbf16>
    %c0_3 = arith.constant 0 : index
    %c0_4 = arith.constant 0 : index
    %4 = vector.load %arg3[%c0_3, %c0_4] : memref<1x512xbf16, #tpu.memory_space<vmem>>, vector<1x512xbf16>
    %5 = vector.broadcast %4 : vector<1x512xbf16> to vector<16x512xbf16>
    %6 = arith.addf %3, %5 : vector<16x512xbf16>
    %cst_5 = arith.constant 2.001950e-01 : bf16
    %7 = vector.broadcast %cst_5 : bf16 to vector<16x512xbf16>
    %8 = arith.mulf %7, %6 : vector<16x512xbf16>
    %9 = arith.maximumf %6, %8 : vector<16x512xbf16>
    %c0_6 = arith.constant 0 : index
    %c0_7 = arith.constant 0 : index
    %10 = vector.load %arg4[%c0_6, %c0_7] : memref<512x256xbf16, #tpu.memory_space<vmem>>, vector<512x256xbf16>
    %cst_8 = arith.constant dense<0.000000e+00> : vector<16x256xf32>
    %11 = tpu.matmul %9, %10, %cst_8 {dimension_numbers = #tpu.dot_dimension_numbers<[1], [0], [0], [1], [0, 0, 1, 1], [], []>} : vector<16x512xbf16>, vector<512x256xbf16>, vector<16x256xf32> -> vector<16x256xf32>
    %12 = arith.truncf %11 : vector<16x256xf32> to vector<16x256xbf16>
    %c0_9 = arith.constant 0 : index
    %c0_10 = arith.constant 0 : index
    %13 = vector.load %arg5[%c0_9, %c0_10] : memref<1x256xbf16, #tpu.memory_space<vmem>>, vector<1x256xbf16>
    %14 = vector.broadcast %13 : vector<1x256xbf16> to vector<16x256xbf16>
    %15 = arith.addf %12, %14 : vector<16x256xbf16>
    %cst_11 = arith.constant 2.001950e-01 : bf16
    %16 = vector.broadcast %cst_11 : bf16 to vector<16x256xbf16>
    %17 = arith.mulf %16, %15 : vector<16x256xbf16>
    %18 = arith.maximumf %15, %17 : vector<16x256xbf16>
    %c0_12 = arith.constant 0 : index
    %c0_13 = arith.constant 0 : index
    %19 = vector.load %arg6[%c0_12, %c0_13] : memref<256x128xbf16, #tpu.memory_space<vmem>>, vector<256x128xbf16>
    %cst_14 = arith.constant dense<0.000000e+00> : vector<16x128xf32>
    %20 = tpu.matmul %18, %19, %cst_14 {dimension_numbers = #tpu.dot_dimension_numbers<[1], [0], [0], [1], [0, 0, 1, 1], [], []>} : vector<16x256xbf16>, vector<256x128xbf16>, vector<16x128xf32> -> vector<16x128xf32>
    %21 = arith.truncf %20 : vector<16x128xf32> to vector<16x128xbf16>
    %c0_15 = arith.constant 0 : index
    %c0_16 = arith.constant 0 : index
    %22 = vector.load %arg7[%c0_15, %c0_16] : memref<1x128xbf16, #tpu.memory_space<vmem>>, vector<1x128xbf16>
    %23 = vector.broadcast %22 : vector<1x128xbf16> to vector<16x128xbf16>
    %24 = arith.addf %21, %23 : vector<16x128xbf16>
    %cst_17 = arith.constant 2.001950e-01 : bf16
    %25 = vector.broadcast %cst_17 : bf16 to vector<16x128xbf16>
    %26 = arith.mulf %25, %24 : vector<16x128xbf16>
    %27 = arith.maximumf %24, %26 : vector<16x128xbf16>
    %c0_18 = arith.constant 0 : index
    %c0_19 = arith.constant 0 : index
    %28 = vector.load %arg8[%c0_18, %c0_19] : memref<128x1xbf16, #tpu.memory_space<vmem>>, vector<128x1xbf16>
    %cst_20 = arith.constant dense<0.000000e+00> : vector<16x1xf32>
    %29 = tpu.matmul %27, %28, %cst_20 {dimension_numbers = #tpu.dot_dimension_numbers<[1], [0], [0], [1], [0, 0, 1, 1], [], []>} : vector<16x128xbf16>, vector<128x1xbf16>, vector<16x1xf32> -> vector<16x1xf32>
    %c0_21 = arith.constant 0 : index
    %c0_22 = arith.constant 0 : index
    %30 = vector.load %arg9[%c0_21, %c0_22] : memref<1x1xf32, #tpu.memory_space<vmem>>, vector<1x1xf32>
    %31 = vector.broadcast %30 : vector<1x1xf32> to vector<16x1xf32>
    %32 = arith.addf %29, %31 : vector<16x1xf32>
    %c0_23 = arith.constant 0 : index
    %c0_24 = arith.constant 0 : index
    %33 = vector.load %arg10[%c0_23, %c0_24] : memref<16x1xf32, #tpu.memory_space<vmem>>, vector<16x1xf32>
    tpu.vector_store %arg10[%c0_23, %c0_24], %32 {strides = array<i32>} : memref<16x1xf32, #tpu.memory_space<vmem>>, vector<16x1xf32>,
    return
  }
  func.func @transform_0(%arg0: i32) -> (i32, i32) {
    %c0_i32 = arith.constant 0 : i32
    %c0_i32_0 = arith.constant 0 : i32
    return %arg0, %c0_i32 : i32, i32
  }
  func.func @transform_1(%arg0: i32) -> (i32, i32) {
    %c0_i32 = arith.constant 0 : i32
    %c0_i32_0 = arith.constant 0 : i32
    %c0_i32_1 = arith.constant 0 : i32
    return %c0_i32, %c0_i32_0 : i32, i32
  }
  func.func @transform_2(%arg0: i32) -> (i32, i32) {
    %c0_i32 = arith.constant 0 : i32
    %c0_i32_0 = arith.constant 0 : i32
    %c0_i32_1 = arith.constant 0 : i32
    return %c0_i32, %c0_i32_0 : i32, i32
  }
  func.func @transform_3(%arg0: i32) -> (i32, i32) {
    %c0_i32 = arith.constant 0 : i32
    %c0_i32_0 = arith.constant 0 : i32
    %c0_i32_1 = arith.constant 0 : i32
    return %c0_i32, %c0_i32_0 : i32, i32
  }
  func.func @transform_4(%arg0: i32) -> (i32, i32) {
    %c0_i32 = arith.constant 0 : i32
    %c0_i32_0 = arith.constant 0 : i32
    %c0_i32_1 = arith.constant 0 : i32
    return %c0_i32, %c0_i32_0 : i32, i32
  }
  func.func @transform_5(%arg0: i32) -> (i32, i32) {
    %c0_i32 = arith.constant 0 : i32
    %c0_i32_0 = arith.constant 0 : i32
    %c0_i32_1 = arith.constant 0 : i32
    return %c0_i32, %c0_i32_0 : i32, i32
  }
  func.func @transform_6(%arg0: i32) -> (i32, i32) {
    %c0_i32 = arith.constant 0 : i32
    %c0_i32_0 = arith.constant 0 : i32
    %c0_i32_1 = arith.constant 0 : i32
    return %c0_i32, %c0_i32_0 : i32, i32
  }
  func.func @transform_7(%arg0: i32) -> (i32, i32) {
    %c0_i32 = arith.constant 0 : i32
    %c0_i32_0 = arith.constant 0 : i32
    %c0_i32_1 = arith.constant 0 : i32
    return %c0_i32, %c0_i32_0 : i32, i32
  }
  func.func @transform_8(%arg0: i32) -> (i32, i32) {
    %c0_i32 = arith.constant 0 : i32
    %c0_i32_0 = arith.constant 0 : i32
    %c0_i32_1 = arith.constant 0 : i32
    return %c0_i32, %c0_i32_0 : i32, i32
  }
  func.func @transform_9(%arg0: i32) -> (i32, i32) {
    %c0_i32 = arith.constant 0 : i32
    %c0_i32_0 = arith.constant 0 : i32
    return %arg0, %c0_i32 : i32, i32
  }
}

</mosaic_0001>

<bundles_post_ra>
// kernel: tpu_custom_call.1
= control target key start
LH: loop header
LB: loop body
LE: loop exit
PB: predicated region body
PF: predicated region fallthrough
CT: control target
= control target key end

     0   :  { %s1851_s0 = inlined_call_operand.vmem [shape: bf16[16,128], index: 0, kind: input, shape index: {}]   ;;  %s1852_s1 = inlined_call_operand.hbm [shape: bf16[128,512], index: 1, kind: input, shape index: {}]   ;;  %s1853_s2 = inlined_call_operand.vmem [shape: bf16[1,512], index: 2, kind: input, shape index: {}]   ;;  %s1854_s3 = inlined_call_operand.hbm [shape: bf16[512,256], index: 3, kind: input, shape index: {}]   ;;  %s1855_s4 = inlined_call_operand.vmem [shape: bf16[1,256], index: 4, kind: input, shape index: {}]   ;;  %s1856_s5 = inlined_call_operand.hbm [shape: bf16[256,128], index: 5, kind: input, shape index: {}]   ;;  %s1857_s6 = inlined_call_operand.vmem [shape: bf16[1,128], index: 6, kind: input, shape index: {}]   ;;  %s1858_s7 = inlined_call_operand.vmem [shape: bf16[128,1], index: 7, kind: input, shape index: {}]   ;;  %s1859_s8 = inlined_call_operand.<no memory space> [shape: f32[1,1], index: 8, kind: input, shape index: {}]   ;;  %s1860_s9 = inlined_call_operand.vmem [shape: f32[16,1], index: 9, kind: output, shape index: {}]  }
   0x1   :  { %v14_v0 = vstv %s1859_s8 }
   0x2   :  { %15 = vst [vmem:[#allocation2] sm:$0x1] %v14_v0 }
   0x3   :  { %16 = vsyncpa [#allocation4], 0 }
   0x4   :  { %17 = vsyncpa [#allocation6], 0  ;;  %s1682_s11 = smov [#allocation5]   ;;  %s1612_s15 = scalar_lea.hbm %s1854_s3, 8192 }
   0x5   :  { %s39_s12 = sshll.u32 %s1682_s11, 4  ;;  %p1613_p0 = scmp.ne.s32.totalorder %s1854_s3, %s1612_s15  ;;  %s40_s12 = int_to_ptr.vmem [resolvable:$true] %s39_s12 }
   0x6   :  { %p1616_p1 = scmp.lt.u32.totalorder %s1612_s15, %s1854_s3 }
   0x8   :  { %p1618_p2 = pnand %p1616_p1, %p1613_p0 }
   0xa   :  { %1621 = shalt.err (!%p1618_p2)
}
   0xb   :  { %s1622_s8 = scalar_lea.vmem %s40_s12, 8192  ;;  %p1627_p4 = scmp.lt.s32.totalorder %s40_s12, %s40_s12 }
   0xc   :  { %p1623_p3 = scmp.ne.s32.totalorder %s40_s12, %s1622_s8  ;;  %p1628_p5 = scmp.lt.s32.totalorder %s1622_s8, %s1622_s8 }
   0xe   :  { %p1629_p6 = por %p1628_p5, %p1627_p4 }
  0x10   :  { %p1630_p7 = pnand %p1629_p6, %p1623_p3 }
  0x12   :  { %1633 = shalt.err (!%p1630_p7)
}
  0x13   :  { %s1683_s20 = smov 128   ;;  %s1684_s21 = smov 8  }
  0x14   :  { %45 = dma.hbm_to_vmem [thread:$0]  %s1854_s3, 8192, %s40_s12, [#allocation6], %s1683_s20, %s1683_s20, %s1684_s21  }
  0x15   :  { %s1685_s24 = smov [#allocation3]   ;;  %s1634_s28 = scalar_lea.hbm %s1852_s1, 4096 }
  0x16   :  { %s25_s25 = sshll.u32 %s1685_s24, 4  ;;  %p1635_p8 = scmp.ne.s32.totalorder %s1852_s1, %s1634_s28  ;;  %s26_s25 = int_to_ptr.vmem [resolvable:$true] %s25_s25 }
  0x17   :  { %p1638_p9 = scmp.lt.u32.totalorder %s1634_s28, %s1852_s1 }
  0x19   :  { %p1640_p10 = pnand %p1638_p9, %p1635_p8 }
  0x1b   :  { %1643 = shalt.err (!%p1640_p10)
}
  0x1c   :  { %s1644_s13 = scalar_lea.vmem %s26_s25, 4096  ;;  %p1649_p12 = scmp.lt.s32.totalorder %s26_s25, %s26_s25 }
  0x1d   :  { %p1645_p11 = scmp.ne.s32.totalorder %s26_s25, %s1644_s13  ;;  %p1650_p13 = scmp.lt.s32.totalorder %s1644_s13, %s1644_s13 }
  0x1f   :  { %p1651_p0 = por %p1650_p13, %p1649_p12 }
  0x21   :  { %p1652_p1 = pnand %p1651_p0, %p1645_p11 }
  0x23   :  { %1655 = shalt.err (!%p1652_p1)
}
  0x24   :  { %s1686_s3 = smov 256   ;;  %s1687_s12 = smov 16  }
  0x25   :  { %31 = dma.hbm_to_vmem [thread:$0]  %s1852_s1, 4096, %s26_s25, [#allocation4], %s1686_s3, %s1686_s3, %s1687_s12  }
  0x26   :  { %s1688_s16 = smov [#allocation7]   ;;  %s1656_s8 = scalar_lea.hbm %s1856_s5, 2048 }
  0x27   :  { %s53_s17 = sshll.u32 %s1688_s16, 4  ;;  %p1657_p2 = scmp.ne.s32.totalorder %s1856_s5, %s1656_s8  ;;  %s54_s17 = int_to_ptr.vmem [resolvable:$true] %s53_s17 }
  0x28   :  { %p1660_p3 = scmp.lt.u32.totalorder %s1656_s8, %s1856_s5 }
  0x2a   :  { %p1662_p4 = pnand %p1660_p3, %p1657_p2 }
  0x2c   :  { %1665 = shalt.err (!%p1662_p4)
}
  0x2d   :  { %s1666_s24 = scalar_lea.vmem %s54_s17, 2048  ;;  %p1671_p6 = scmp.lt.s32.totalorder %s54_s17, %s54_s17 }
  0x2e   :  { %p1667_p5 = scmp.ne.s32.totalorder %s54_s17, %s1666_s24  ;;  %p1672_p7 = scmp.lt.s32.totalorder %s1666_s24, %s1666_s24 }
  0x30   :  { %p1673_p8 = por %p1672_p7, %p1671_p6 }
  0x32   :  { %p1674_p9 = pnand %p1673_p8, %p1667_p5 }
  0x34   :  { %1677 = shalt.err (!%p1674_p9)
}
  0x35   :  { %s1689_s1 = smov 64   ;;  %s1690_s25 = smov 4  }
  0x36   :  { %59 = dma.hbm_to_vmem [thread:$0]  %s1856_s5, 2048, %s54_s17, [#allocation6], %s1689_s1, %s1689_s1, %s1690_s25  }
  0x37   :  { %1678 = dma.done.wait [#allocation4], 4096  }
  0x38   :  { %1679 = vsyncadd [#allocation4], 4294963200 }
  0x39   :  { %1680 = dma.done.wait [#allocation6], 10240  }
  0x3a   :  { %1681 = vsyncadd [#allocation6], 4294957056  ;;  %v1691_v1 = vmov 0   ;;  %v1443_v2 = vld [vmem:[#allocation3 + $0x4] ss:$16 sps:$4 sm:$0xff]   ;;  %vm1694_vm0 = vmmov 0  }
  0x3b   :  { %309 = vmatprep.mubr.bf16.mxu1 %v1691_v1  ;;  %v1445_v3 = vld [vmem:[#allocation3] ss:$16 sps:$4 sm:$0xff]   ;;  %277 = vmatprep.subr.bf16.mxu1 %v1443_v2  ;;  %v1446_v4 = vld [vmem:[#allocation3 + $0x24] ss:$16 sps:$4 sm:$0xff]   ;;  %v1470_v23 = vld [vmem:[#allocation3 + $0xc] ss:$16 sps:$4 sm:$0xff]  }
  0x3c   :  { %278 = vmatpush1.bf16.msra.mxu1 %v1445_v3  ;;  %v1448_v5 = vld [vmem:[#allocation3 + $0x20] ss:$16 sps:$4 sm:$0xff]   ;;  %v1449_v6 = vld [vmem:[#allocation3 + $0x44] ss:$16 sps:$4 sm:$0xff]   ;;  %v1468_v26 = vld [vmem:[#allocation3 + $0x8] ss:$16 sps:$4 sm:$0xff]  }
  0x3d   :  { %279 = vmatprep.subr.bf16.mxu1 %v1446_v4  ;;  %v1451_v7 = vld [vmem:[#allocation3 + $0x40] ss:$16 sps:$4 sm:$0xff]   ;;  %v1452_v8 = vld [vmem:[#allocation3 + $0x64] ss:$16 sps:$4 sm:$0xff]   ;;  %v1473_v27 = vld [vmem:[#allocation3 + $0x2c] ss:$16 sps:$4 sm:$0xff]  }
  0x3e   :  { %v1454_v9 = vld [vmem:[#allocation3 + $0x60] ss:$16 sps:$4 sm:$0xff]   ;;  %v1455_v10 = vld [vmem:[#allocation3 + $0x84] ss:$16 sps:$4 sm:$0xff]   ;;  %v1471_v30 = vld [vmem:[#allocation3 + $0x28] ss:$16 sps:$4 sm:$0xff]  }
  0x3f   :  { %v1457_v11 = vld [vmem:[#allocation3 + $0x80] ss:$16 sps:$4 sm:$0xff]   ;;  %v1458_v12 = vld [vmem:[#allocation3 + $0xa4] ss:$16 sps:$4 sm:$0xff]   ;;  %v1476_v32 = vld [vmem:[#allocation3 + $0x4c] ss:$16 sps:$4 sm:$0xff]  }
  0x40   :  { %280 = vmatpush1.bf16.msra.mxu1 %v1448_v5  ;;  %v1460_v13 = vld [vmem:[#allocation3 + $0xa0] ss:$16 sps:$4 sm:$0xff]   ;;  %v1461_v14 = vld [vmem:[#allocation3 + $0xc4] ss:$16 sps:$4 sm:$0xff]   ;;  %v1474_v33 = vld [vmem:[#allocation3 + $0x48] ss:$16 sps:$4 sm:$0xff]  }
  0x41   :  { %281 = vmatprep.subr.bf16.mxu1 %v1449_v6  ;;  %v1463_v15 = vld [vmem:[#allocation3 + $0xc0] ss:$16 sps:$4 sm:$0xff]   ;;  %v1492_v16 = vld [vmem:[#allocation5 + $0x4] ss:$8 sps:$4 sm:$0xff]   ;;  %v1495_v19 = vld [vmem:[#allocation5 + $0x14] ss:$8 sps:$4 sm:$0xff]  }
  0x42   :  { %v1494_v17 = vld [vmem:[#allocation5] ss:$8 sps:$4 sm:$0xff]   ;;  %v1464_v18 = vld [vmem:[#allocation3 + $0xe4] ss:$16 sps:$4 sm:$0xff]   ;;  %817 = vmatprep.subr.bf16.mxu0 %v1492_v16  ;;  %v1497_v20 = vld [vmem:[#allocation5 + $0x10] ss:$8 sps:$4 sm:$0xff]   ;;  %v380_v16 = vlaneseq }
  0x43   :  { %818 = vmatpush1.bf16.msra.mxu0 %v1494_v17  ;;  %v1466_v21 = vld [vmem:[#allocation3 + $0xe0] ss:$16 sps:$4 sm:$0xff]   ;;  %v1498_v22 = vld [vmem:[#allocation5 + $0x24] ss:$8 sps:$4 sm:$0xff]   ;;  %v1501_v28 = vld [vmem:[#allocation5 + $0x34] ss:$8 sps:$4 sm:$0xff]  }
  0x44   :  { %282 = vmatpush1.bf16.msra.mxu1 %v1451_v7  ;;  %819 = vmatprep.subr.bf16.mxu0 %v1495_v19  ;;  %v1787_v24 = vld [vmem:[%s1851_s0] sm:$0xff]   ;;  %v1503_v29 = vld [vmem:[#allocation5 + $0x30] ss:$8 sps:$4 sm:$0xff]   ;;  %v1590_v6 = vld [vmem:[#allocation7 + $0x48] sm:$0xff]   ;;  %vm1242_vm1 = vcmask 7168  }
  0x45   :  { %283 = vmatprep.subr.bf16.mxu1 %v1452_v8  ;;  %v1500_v25 = vld [vmem:[#allocation5 + $0x20] ss:$8 sps:$4 sm:$0xff]   ;;  %v1504_v31 = vld [vmem:[#allocation5 + $0x44] ss:$8 sps:$4 sm:$0xff]   ;;  %v1507_v36 = vld [vmem:[#allocation5 + $0x54] ss:$8 sps:$4 sm:$0xff]  }
  0x46   :  { %v1506_v34 = vld [vmem:[#allocation5 + $0x40] ss:$8 sps:$4 sm:$0xff]   ;;  %v1479_v35 = vld [vmem:[#allocation3 + $0x6c] ss:$16 sps:$4 sm:$0xff]   ;;  %v1509_v37 = vld [vmem:[#allocation5 + $0x50] ss:$8 sps:$4 sm:$0xff]  }
  0x47   :  { %820 = vmatpush1.bf16.msra.mxu0 %v1497_v20  ;;  %v1477_v38 = vld [vmem:[#allocation3 + $0x68] ss:$16 sps:$4 sm:$0xff]   ;;  %v1510_v39 = vld [vmem:[#allocation5 + $0x64] ss:$8 sps:$4 sm:$0xff]   ;;  %v1513_v43 = vld [vmem:[#allocation5 + $0x74] ss:$8 sps:$4 sm:$0xff]  }
  0x48   :  { %284 = vmatpush1.bf16.msra.mxu1 %v1454_v9  ;;  %821 = vmatprep.subr.bf16.mxu0 %v1498_v22  ;;  %v1482_v40 = vld [vmem:[#allocation3 + $0x8c] ss:$16 sps:$4 sm:$0xff]   ;;  %v1512_v41 = vld [vmem:[#allocation5 + $0x60] ss:$8 sps:$4 sm:$0xff]   ;;  %v1515_v45 = vld [vmem:[#allocation5 + $0x70] ss:$8 sps:$4 sm:$0xff]  }
  0x49   :  { %285 = vmatprep.subr.bf16.mxu1 %v1455_v10  ;;  %v1480_v42 = vld [vmem:[#allocation3 + $0x88] ss:$16 sps:$4 sm:$0xff]   ;;  %v1485_v44 = vld [vmem:[#allocation3 + $0xac] ss:$16 sps:$4 sm:$0xff]   ;;  %v1588_v4 = vld [vmem:[#allocation7 + $0x40] sm:$0xff]  }
  0x4a   :  { %v1483_v46 = vld [vmem:[#allocation3 + $0xa8] ss:$16 sps:$4 sm:$0xff]   ;;  %v1516_v47 = vld [vmem:[#allocation5 + $0x84] ss:$8 sps:$4 sm:$0xff]   ;;  %v1519_v51 = vld [vmem:[#allocation5 + $0x94] ss:$8 sps:$4 sm:$0xff]  }
  0x4b   :  { %822 = vmatpush1.bf16.msra.mxu0 %v1500_v25  ;;  %v1488_v48 = vld [vmem:[#allocation3 + $0xcc] ss:$16 sps:$4 sm:$0xff]   ;;  %v1518_v49 = vld [vmem:[#allocation5 + $0x80] ss:$8 sps:$4 sm:$0xff]   ;;  %v1521_v53 = vld [vmem:[#allocation5 + $0x90] ss:$8 sps:$4 sm:$0xff]  }
  0x4c   :  { %286 = vmatpush1.bf16.msra.mxu1 %v1457_v11  ;;  %823 = vmatprep.subr.bf16.mxu0 %v1501_v28  ;;  %v1486_v50 = vld [vmem:[#allocation3 + $0xc8] ss:$16 sps:$4 sm:$0xff]   ;;  %v1491_v52 = vld [vmem:[#allocation3 + $0xec] ss:$16 sps:$4 sm:$0xff]   ;;  %v1589_v5 = vld [vmem:[#allocation7] sm:$0xff]  }
  0x4d   :  { %287 = vmatprep.subr.bf16.mxu1 %v1458_v12  ;;  %v1489_v54 = vld [vmem:[#allocation3 + $0xe8] ss:$16 sps:$4 sm:$0xff]   ;;  %v1522_v55 = vld [vmem:[#allocation5 + $0xa4] ss:$8 sps:$4 sm:$0xff]   ;;  %v1525_v57 = vld [vmem:[#allocation5 + $0xb4] ss:$8 sps:$4 sm:$0xff]  }
  0x4e   :  { %v1524_v56 = vld [vmem:[#allocation5 + $0xa0] ss:$8 sps:$4 sm:$0xff]   ;;  %v1527_v58 = vld [vmem:[#allocation5 + $0xb0] ss:$8 sps:$4 sm:$0xff]   ;;  %v1528_v59 = vld [vmem:[#allocation5 + $0xc4] ss:$8 sps:$4 sm:$0xff]  }
  0x4f   :  { %824 = vmatpush1.bf16.msra.mxu0 %v1503_v29  ;;  %v1530_v60 = vld [vmem:[#allocation5 + $0xc0] ss:$8 sps:$4 sm:$0xff]   ;;  %v1531_v61 = vld [vmem:[#allocation5 + $0xd4] ss:$8 sps:$4 sm:$0xff]   ;;  %v1533_v62 = vld [vmem:[#allocation5 + $0xd0] ss:$8 sps:$4 sm:$0xff]  }
  0x50   :  { %288 = vmatpush1.bf16.msra.mxu1 %v1460_v13  ;;  %825 = vmatprep.subr.bf16.mxu0 %v1504_v31  ;;  %v1534_v63 = vld [vmem:[#allocation5 + $0xe4] ss:$8 sps:$4 sm:$0xff]   ;;  %v1536_v0 = vld [vmem:[#allocation5 + $0xe0] ss:$8 sps:$4 sm:$0xff]   ;;  %v1539_v2 = vld [vmem:[#allocation5 + $0xf0] ss:$8 sps:$4 sm:$0xff]  }
  0x51   :  { %289 = vmatprep.subr.bf16.mxu1 %v1461_v14  ;;  %v1542_v3 = vld [vmem:[#allocation5 + $0x104] ss:$8 sps:$4 sm:$0xff]   ;;  %v1592_v8 = vld [vmem:[#allocation7 + $0x50] sm:$0xff]   ;;  %v1594_v10 = vld [vmem:[#allocation7 + $0x58] sm:$0xff]   ;;  %v1692_v14 = vmov 1966171168  }
  0x52   :  { %v1591_v7 = vld [vmem:[#allocation7 + $0x8] sm:$0xff]   ;;  %v1593_v9 = vld [vmem:[#allocation7 + $0x10] sm:$0xff]   ;;  %v1595_v11 = vld [vmem:[#allocation7 + $0x18] sm:$0xff]  }
  0x53   :  { %826 = vmatpush1.bf16.msra.mxu0 %v1506_v34  ;;  %v1596_v12 = vld [vmem:[#allocation7 + $0x60] sm:$0xff]  }
  0x54   :  { %290 = vmatpush1.bf16.msra.mxu1 %v1463_v15  ;;  %827 = vmatprep.subr.bf16.mxu0 %v1507_v36  ;;  %v1597_v13 = vld [vmem:[#allocation7 + $0x20] sm:$0xff]   ;;  %v378_v15 = vunpack.c.l.s4 %v1692_v14 }
  0x55   :  { %291 = vmatprep.subr.bf16.mxu1 %v1464_v18  ;;  %v381_v18 = vshrl.u32 %v380_v16, 7  ;;  %v1284_v19 = vld.sshfl [vmem:[%s1853_s2] sm:$0x33 pattern:$0x75316420] }
  0x56   :  { %v379_v17 = vunpack.c.0.s8 %v378_v15  ;;  %v1576_v14 = vld [vmem:[#allocation5 + $0x1c0] ss:$8 sps:$4 sm:$0xff]   ;;  %v1581_v16 = vld [vmem:[#allocation5 + $0x1d4] ss:$8 sps:$4 sm:$0xff]  }
  0x57   :  { %828 = vmatpush1.bf16.msra.mxu0 %v1509_v37  ;;  %v1802_v25 = vsub.s32 0, %v381_v18 }
  0x58   :  { %292 = vmatpush1.bf16.msra.mxu1 %v1466_v21  ;;  %829 = vmatprep.subr.bf16.mxu0 %v1510_v39  ;;  %v1794_v20 = vsub.s32 %v379_v17, %v381_v18  ;;  %v376_v21 = vcombine.high %v1284_v19, %v1284_v19  ;;  %v1579_v17 = vld [vmem:[#allocation5 + $0x1d0] ss:$8 sps:$4 sm:$0xff]  }
  0x59   :  { %320 = vmatprep.subr.bf16.mxu1 %v1470_v23 }
  0x5a   :  { %v1797_v22 = vrot.slane %v1284_v19, %v1794_v20  ;;  %v390_v23 = vrot.slane %v376_v21, %v1794_v20  ;;  %v1584_v19 = vld [vmem:[#allocation5 + $0x1e4] ss:$8 sps:$4 sm:$0xff]   ;;  %v1582_v21 = vld [vmem:[#allocation5 + $0x1e0] ss:$8 sps:$4 sm:$0xff]  }
  0x5b   :  { %310 = vmatmul.mubr.bf16.vlgmr.msra.gmra.mrb[0].mxu1 %v1787_v24  ;;  %830 = vmatpush1.bf16.msra.mxu0 %v1512_v41 }
  0x5c   :  { %321 = vmatpush1.bf16.msra.mxu1 %v1468_v26  ;;  %352 = vmatprep.mubr.bf16.mxu1 %v1691_v1  ;;  %v1537_v1 = vld [vmem:[#allocation5 + $0xf4] ss:$8 sps:$4 sm:$0xff]   ;;  %v401_v26 = vpack.i.b16 %v390_v23, %v390_v23 }
  0x5d   :  { %322 = vmatprep.subr.bf16.mxu1 %v1473_v27  ;;  %831 = vmatprep.subr.bf16.mxu0 %v1513_v43  ;;  %v1543_v43 = vld [vmem:[#allocation5 + $0x110] ss:$8 sps:$4 sm:$0xff]  }
  0x5e   :  { %v406_v31 = vrot.slane %v401_v26, %v1802_v25  ;;  %v1585_v26 = vld [vmem:[#allocation5 + $0x1f0] ss:$8 sps:$4 sm:$0xff]  }
  0x5f   :  { %832 = vmatpush1.bf16.msra.mxu0 %v1515_v45  ;;  %v1546_v45 = vld [vmem:[#allocation5 + $0x120] ss:$8 sps:$4 sm:$0xff]  }
  0x60   :  { %323 = vmatpush1.bf16.msra.mxu1 %v1471_v30  ;;  %833 = vmatprep.subr.bf16.mxu0 %v1516_v47  ;;  %v1549_v47 = vld [vmem:[#allocation5 + $0x130] ss:$8 sps:$4 sm:$0xff]  }
  0x61   :  { %324 = vmatprep.subr.bf16.mxu1 %v1476_v32 }
  0x63   :  { %834 = vmatpush1.bf16.msra.mxu0 %v1518_v49  ;;  %v1552_v49 = vld [vmem:[#allocation5 + $0x140] ss:$8 sps:$4 sm:$0xff]  }
  0x64   :  { %325 = vmatpush1.bf16.msra.mxu1 %v1474_v33  ;;  %835 = vmatprep.subr.bf16.mxu0 %v1519_v51  ;;  %v1557_v51 = vld [vmem:[#allocation5 + $0x154] ss:$8 sps:$4 sm:$0xff]  }
  0x65   :  { %326 = vmatprep.subr.bf16.mxu1 %v1479_v35 }
  0x67   :  { %836 = vmatpush1.bf16.msra.mxu0 %v1521_v53 }
  0x68   :  { %327 = vmatpush1.bf16.msra.mxu1 %v1477_v38  ;;  %837 = vmatprep.subr.bf16.mxu0 %v1522_v55 }
  0x69   :  { %328 = vmatprep.subr.bf16.mxu1 %v1482_v40  ;;  %v1540_v40 = vld [vmem:[#allocation5 + $0x100] ss:$8 sps:$4 sm:$0xff]  }
  0x6b   :  { %838 = vmatpush1.bf16.msra.mxu0 %v1524_v56 }
  0x6c   :  { %329 = vmatpush1.bf16.msra.mxu1 %v1480_v42  ;;  %839 = vmatprep.subr.bf16.mxu0 %v1525_v57  ;;  %v1545_v42 = vld [vmem:[#allocation5 + $0x114] ss:$8 sps:$4 sm:$0xff]   ;;  %v1558_v57 = vld [vmem:[#allocation5 + $0x160] ss:$8 sps:$4 sm:$0xff]  }
  0x6d   :  { %330 = vmatprep.subr.bf16.mxu1 %v1485_v44  ;;  %v1548_v44 = vld [vmem:[#allocation5 + $0x124] ss:$8 sps:$4 sm:$0xff]  }
  0x6f   :  { %840 = vmatpush1.bf16.msra.mxu0 %v1527_v58 }
  0x70   :  { %331 = vmatpush1.bf16.msra.mxu1 %v1483_v46  ;;  %841 = vmatprep.subr.bf16.mxu0 %v1528_v59  ;;  %v1551_v46 = vld [vmem:[#allocation5 + $0x134] ss:$8 sps:$4 sm:$0xff]  }
  0x71   :  { %332 = vmatprep.subr.bf16.mxu1 %v1488_v48  ;;  %v1554_v48 = vld [vmem:[#allocation5 + $0x144] ss:$8 sps:$4 sm:$0xff]  }
  0x73   :  { %842 = vmatpush1.bf16.msra.mxu0 %v1530_v60  ;;  %v1563_v60 = vld [vmem:[#allocation5 + $0x174] ss:$8 sps:$4 sm:$0xff]  }
  0x74   :  { %333 = vmatpush1.bf16.msra.mxu1 %v1486_v50  ;;  %843 = vmatprep.subr.bf16.mxu0 %v1531_v61  ;;  %v392_v50 = vcombine.high %v390_v23, %v390_v23 }
  0x75   :  { %334 = vmatprep.subr.bf16.mxu1 %v1491_v52  ;;  %v1555_v52 = vld [vmem:[#allocation5 + $0x150] ss:$8 sps:$4 sm:$0xff]  }
  0x76   :  { %v415_v53 = vpack.i.b16 %v392_v50, %v392_v50 }
  0x77   :  { %844 = vmatpush1.bf16.msra.mxu0 %v1533_v62 }
  0x78   :  { %335 = vmatpush1.bf16.msra.mxu1 %v1489_v54  ;;  %845 = vmatprep.subr.bf16.mxu0 %v1534_v63  ;;  %v1560_v54 = vld [vmem:[#allocation5 + $0x164] ss:$8 sps:$4 sm:$0xff]   ;;  %v420_v59 = vrot.slane %v415_v53, %v1802_v25 }
  0x79   :  { %1375 = vmatprep.subr.bf16.mxu1 %v1588_v4  ;;  %v1564_v4 = vld [vmem:[#allocation5 + $0x180] ss:$8 sps:$4 sm:$0xff]  }
  0x7b   :  { %353 = vmatmul.mubr.bf16.vlgmr.msra.gmra.mrb[4].mxu1 %v1787_v24  ;;  %846 = vmatpush1.bf16.msra.mxu0 %v1536_v0  ;;  %v394_v24 = vpack.i.b16 %v1797_v22, %v1797_v22  ;;  %v1561_v0 = vld [vmem:[#allocation5 + $0x170] ss:$8 sps:$4 sm:$0xff]  }
  0x7c   :  { %847 = vmatprep.subr.bf16.mxu0 %v1537_v1  ;;  %1376 = vmatpush3.bf16.msra.mxu1 %v1589_v5 }
  0x7d   :  { %1377 = vmatprep.subr.bf16.mxu1 %v1590_v6  ;;  %v399_v29 = vrot.slane %v394_v24, %v1802_v25  ;;  %v1569_v6 = vld [vmem:[#allocation5 + $0x194] ss:$8 sps:$4 sm:$0xff]  }
  0x7e   :  { %v1587_v24 = vld [vmem:[#allocation5 + $0x1f4] ss:$8 sps:$4 sm:$0xff]  }
  0x7f   :  { %848 = vmatpush1.bf16.msra.mxu0 %v1539_v2  ;;  %v1566_v2 = vld [vmem:[#allocation5 + $0x184] ss:$8 sps:$4 sm:$0xff]  }
  0x80   :  { %860 = vmatprep.subr.bf16.mxu0 %v1542_v3  ;;  %1378 = vmatpush3.bf16.msra.mxu1 %v1591_v7  ;;  %v1567_v7 = vld [vmem:[#allocation5 + $0x190] ss:$8 sps:$4 sm:$0xff]  }
  0x81   :  { %1379 = vmatprep.subr.bf16.mxu1 %v1592_v8  ;;  %v1572_v8 = vld [vmem:[#allocation5 + $0x1a4] ss:$8 sps:$4 sm:$0xff]  }
  0x84   :  { %1380 = vmatpush3.bf16.msra.mxu1 %v1593_v9  ;;  %v1570_v9 = vld [vmem:[#allocation5 + $0x1a0] ss:$8 sps:$4 sm:$0xff]  }
  0x85   :  { %1381 = vmatprep.subr.bf16.mxu1 %v1594_v10  ;;  %v1575_v10 = vld [vmem:[#allocation5 + $0x1b4] ss:$8 sps:$4 sm:$0xff]  }
  0x88   :  { %1382 = vmatpush3.bf16.msra.mxu1 %v1595_v11  ;;  %v1573_v11 = vld [vmem:[#allocation5 + $0x1b0] ss:$8 sps:$4 sm:$0xff]  }
  0x89   :  { %1383 = vmatprep.subr.bf16.mxu1 %v1596_v12  ;;  %v391_v12 = vcombine.high %v1797_v22, %v1797_v22 }
  0x8b   :  { %v408_v15 = vpack.i.b16 %v391_v12, %v391_v12 }
  0x8c   :  { %1384 = vmatpush3.bf16.msra.mxu1 %v1597_v13  ;;  %v1578_v13 = vld [vmem:[#allocation5 + $0x1c4] ss:$8 sps:$4 sm:$0xff]  }
  0x8d   :  { %v413_v18 = vrot.slane %v408_v15, %v1802_v25 }
 0x12e   :  { %v311_v27 = vpop.f32.mrb[0].mxu1 }
 0x12f   :  { %v313_v28 = vpop.f32.mrb[1].mxu1 }
 0x130   :  { %v315_v30 = vpop.f32.mrb[2].mxu1 }
 0x131   :  { %v363_v32 = vpack.c.bf16 %v315_v30, %v311_v27  ;;  %v317_v33 = vpop.f32.mrb[3].mxu1  ;;  %v1600_v30 = vld [vmem:[#allocation7 + $0x70] sm:$0xff]  }
 0x132   :  { %v364_v34 = vpack.c.bf16 %v317_v33, %v313_v28  ;;  %v1598_v28 = vld [vmem:[#allocation7 + $0x68] sm:$0xff]   ;;  %v1603_v33 = vld [vmem:[#allocation7 + $0x38] sm:$0xff]  }
 0x133   :  { %v421_v35 = vadd.bf16 %v399_v29, %v363_v32  ;;  %v1599_v29 = vld [vmem:[#allocation7 + $0x28] sm:$0xff]   ;;  %1385 = vmatprep.subr.bf16.mxu1 %v1598_v28  ;;  %v1602_v32 = vld [vmem:[#allocation7 + $0x78] sm:$0xff]  }
 0x134   :  { %v422_v36 = vadd.bf16 %v406_v31, %v364_v34  ;;  %1386 = vmatpush3.bf16.msra.mxu1 %v1599_v29  ;;  %v1601_v31 = vld [vmem:[#allocation7 + $0x30] sm:$0xff]   ;;  %v1693_v34 = vmov 0.0  }
 0x135   :  { %v425_v37 = vmul.bf16 1045249613, %v421_v35  ;;  %1387 = vmatprep.subr.bf16.mxu1 %v1600_v30 }
 0x136   :  { %v426_v38 = vmul.bf16 1045249613, %v422_v36 }
 0x137   :  { %v429_v41 = vmax.bf16 %v425_v37, %v421_v35  ;;  %v1349_v35 = vld.sshfl [vmem:[%s1855_s4] sm:$0x11 pattern:$0x75316420] }
 0x138   :  { %v430_v39 = vmax.bf16 %v426_v38, %v422_v36  ;;  %1388 = vmatpush3.bf16.msra.mxu1 %v1601_v31  ;;  %v914_v36 = vcombine.high %v1349_v35, %v1349_v35  ;;  %v921_v37 = vrot.slane %v1349_v35, %v1794_v20 }
 0x139   :  { %1389 = vmatprep.subr.bf16.mxu1 %v1602_v32 }
 0x13a   :  { %849 = vmatprep.mubr.bf16.mxu0 %v430_v39  ;;  %v928_v38 = vrot.slane %v914_v36, %v1794_v20  ;;  %v930_v39 = vpack.i.b16 %v921_v37, %v921_v37  ;;  %v1604_v20 = vld [vmem:[%s1858_s7] sm:$0xff]  }
 0x13b   :  { %850 = vmatmul.mubr.bf16.vlgmr.msra.gmra.mrb[0].mxu0 %v429_v41 }
 0x13c   :  { %861 = vmatpush1.bf16.msra.mxu0 %v1540_v40  ;;  %1390 = vmatpush3.bf16.msra.mxu1 %v1603_v33  ;;  %v937_v40 = vpack.i.b16 %v928_v38, %v928_v38 }
 0x13d   :  { %862 = vmatprep.subr.bf16.mxu0 %v1545_v42  ;;  %1406 = vmatprep.subr.bf16.mxu1 %v1693_v34 }
 0x140   :  { %863 = vmatpush1.bf16.msra.mxu0 %v1543_v43  ;;  %v935_v43 = vrot.slane %v930_v39, %v1802_v25 }
 0x141   :  { %864 = vmatprep.subr.bf16.mxu0 %v1548_v44 }
 0x144   :  { %865 = vmatpush1.bf16.msra.mxu0 %v1546_v45  ;;  %v942_v45 = vrot.slane %v937_v40, %v1802_v25 }
 0x145   :  { %866 = vmatprep.subr.bf16.mxu0 %v1551_v46 }
 0x148   :  { %867 = vmatpush1.bf16.msra.mxu0 %v1549_v47 }
 0x149   :  { %868 = vmatprep.subr.bf16.mxu0 %v1554_v48 }
 0x14c   :  { %869 = vmatpush1.bf16.msra.mxu0 %v1552_v49 }
 0x14d   :  { %870 = vmatprep.subr.bf16.mxu0 %v1557_v51 }
 0x14e   :  { %v354_v55 = vpop.f32.mrb[4].mxu1 }
 0x14f   :  { %v356_v56 = vpop.f32.mrb[5].mxu1 }
 0x150   :  { %871 = vmatpush1.bf16.msra.mxu0 %v1555_v52  ;;  %v358_v58 = vpop.f32.mrb[6].mxu1 }
 0x151   :  { %872 = vmatprep.subr.bf16.mxu0 %v1560_v54  ;;  %v365_v61 = vpack.c.bf16 %v358_v58, %v354_v55  ;;  %v360_v62 = vpop.f32.mrb[7].mxu1  ;;  %v1605_v55 = vld [vmem:[%s1858_s7 + $0x8] sm:$0xff]   ;;  %v1608_v58 = vld [vmem:[%s1858_s7 + $0x20] sm:$0xff]  }
 0x152   :  { %v366_v63 = vpack.c.bf16 %v360_v62, %v356_v56  ;;  %v1606_v56 = vld [vmem:[%s1858_s7 + $0x10] sm:$0xff]   ;;  %v1119_v62 = vld [vmem:[%s1857_s6] sm:$0x1] }
 0x153   :  { %v423_v23 = vadd.bf16 %v413_v18, %v365_v61  ;;  %v1611_v61 = vld [vmem:[%s1858_s7 + $0x38] sm:$0xff]  }
 0x154   :  { %873 = vmatpush1.bf16.msra.mxu0 %v1558_v57  ;;  %v424_v1 = vadd.bf16 %v420_v59, %v366_v63  ;;  %v1607_v57 = vld [vmem:[%s1858_s7 + $0x18] sm:$0xff]   ;;  %v1609_v59 = vld [vmem:[%s1858_s7 + $0x28] sm:$0xff]  }
 0x155   :  { %874 = vmatprep.subr.bf16.mxu0 %v1563_v60  ;;  %v427_v22 = vmul.bf16 1045249613, %v423_v23  ;;  %v1610_v60 = vld [vmem:[%s1858_s7 + $0x30] sm:$0xff]  }
 0x156   :  { %v428_v3 = vmul.bf16 1045249613, %v424_v1 }
 0x157   :  { %v431_v27 = vmax.bf16 %v427_v22, %v423_v23 }
 0x158   :  { %875 = vmatpush1.bf16.msra.mxu0 %v1561_v0  ;;  %v432_v5 = vmax.bf16 %v428_v3, %v424_v1  ;;  %v1121_v0 = vpack.i.b16 %v1119_v62, %v1119_v62 }
 0x159   :  { %876 = vmatprep.subr.bf16.mxu0 %v1566_v2 }
 0x15a   :  { %892 = vmatprep.mubr.bf16.mxu0 %v432_v5 }
 0x15c   :  { %877 = vmatpush1.bf16.msra.mxu0 %v1564_v4 }
 0x15d   :  { %878 = vmatprep.subr.bf16.mxu0 %v1569_v6  ;;  %v1126_v6 = vrot.slane %v1121_v0, %v1802_v25 }
 0x160   :  { %879 = vmatpush1.bf16.msra.mxu0 %v1567_v7 }
 0x161   :  { %880 = vmatprep.subr.bf16.mxu0 %v1572_v8 }
 0x164   :  { %881 = vmatpush1.bf16.msra.mxu0 %v1570_v9 }
 0x165   :  { %882 = vmatprep.subr.bf16.mxu0 %v1575_v10 }
 0x168   :  { %883 = vmatpush1.bf16.msra.mxu0 %v1573_v11  ;;  %v1366_v11 = vld [vmem:[#allocation2] ss:$0 sm:$0xff] }
 0x169   :  { %884 = vmatprep.subr.bf16.mxu0 %v1578_v13 }
 0x16c   :  { %885 = vmatpush1.bf16.msra.mxu0 %v1576_v14 }
 0x16d   :  { %886 = vmatprep.subr.bf16.mxu0 %v1581_v16 }
 0x170   :  { %887 = vmatpush1.bf16.msra.mxu0 %v1579_v17 }
 0x171   :  { %888 = vmatprep.subr.bf16.mxu0 %v1584_v19 }
 0x174   :  { %889 = vmatpush1.bf16.msra.mxu0 %v1582_v21 }
 0x175   :  { %890 = vmatprep.subr.bf16.mxu0 %v1587_v24 }
 0x178   :  { %891 = vmatpush1.bf16.msra.mxu0 %v1585_v26 }
 0x17b   :  { %893 = vmatmul.mubr.bf16.vlgmr.msra.gmra.mrb[0].mxu0 %v431_v27 }
 0x24e   :  { %v894_v41 = vpop.f32.mrb[0].mxu0 }
 0x24f   :  { %v896_v42 = vpop.f32.mrb[1].mxu0 }
 0x250   :  { %v898_v44 = vpop.f32.mrb[2].mxu0 }
 0x251   :  { %v903_v46 = vpack.c.bf16 %v898_v44, %v894_v41  ;;  %v900_v47 = vpop.f32.mrb[3].mxu0 }
 0x252   :  { %v904_v48 = vpack.c.bf16 %v900_v47, %v896_v42 }
 0x253   :  { %v943_v49 = vadd.bf16 %v935_v43, %v903_v46 }
 0x254   :  { %v944_v50 = vadd.bf16 %v942_v45, %v904_v48 }
 0x255   :  { %v945_v51 = vmul.bf16 1045249613, %v943_v49 }
 0x256   :  { %v946_v52 = vmul.bf16 1045249613, %v944_v50 }
 0x257   :  { %v947_v54 = vmax.bf16 %v945_v51, %v943_v49 }
 0x258   :  { %v948_v53 = vmax.bf16 %v946_v52, %v944_v50 }
 0x25a   :  { %1109 = vmatprep.mubr.bf16.mxu1 %v948_v53 }
 0x25b   :  { %1110 = vmatmul.mubr.bf16.vlgmr.msra.gmra.mrb[8].mxu1 %v947_v54 }
 0x25c   :  { %1407 = vmatpush3.bf16.msra.mxu1 %v1604_v20  ;;  %1422 = vmatprep.mubr.msk.bf16.mxu1 %vm1694_vm0, %v1693_v34 }
 0x25d   :  { %1408 = vmatprep.subr.bf16.mxu1 %v1693_v34 }
 0x260   :  { %1409 = vmatpush3.bf16.msra.mxu1 %v1605_v55 }
 0x261   :  { %1410 = vmatprep.subr.bf16.mxu1 %v1693_v34 }
 0x264   :  { %1411 = vmatpush3.bf16.msra.mxu1 %v1606_v56 }
 0x265   :  { %1412 = vmatprep.subr.bf16.mxu1 %v1693_v34 }
 0x268   :  { %1413 = vmatpush3.bf16.msra.mxu1 %v1607_v57 }
 0x269   :  { %1414 = vmatprep.subr.bf16.mxu1 %v1693_v34 }
 0x26c   :  { %1415 = vmatpush3.bf16.msra.mxu1 %v1608_v58 }
 0x26d   :  { %1416 = vmatprep.subr.bf16.mxu1 %v1693_v34 }
 0x270   :  { %1417 = vmatpush3.bf16.msra.mxu1 %v1609_v59 }
 0x271   :  { %1418 = vmatprep.subr.bf16.mxu1 %v1693_v34 }
 0x274   :  { %1419 = vmatpush3.bf16.msra.mxu1 %v1610_v60 }
 0x275   :  { %1420 = vmatprep.subr.bf16.mxu1 %v1693_v34 }
 0x278   :  { %1421 = vmatpush3.bf16.msra.mxu1 %v1611_v61 }
 0x32e   :  { %v1391_v63 = vpop.f32.mrb[8].mxu1 }
 0x32f   :  { %v1392_v1 = vpop.f32.mrb[9].mxu1 }
 0x330   :  { %v1393_v2 = vadd.f32 %v1392_v1, %v1391_v63  ;;  %v1394_v3 = vpop.f32.mrb[10].mxu1 }
 0x331   :  { %v1395_v4 = vpop.f32.mrb[11].mxu1 }
 0x332   :  { %v1396_v5 = vadd.f32 %v1395_v4, %v1394_v3 }
 0x334   :  { %v1118_v7 = vpack.c.bf16 %v1396_v5, %v1393_v2 }
 0x336   :  { %v1127_v8 = vadd.bf16 %v1126_v6, %v1118_v7 }
 0x338   :  { %v1128_v9 = vmul.bf16 1045249613, %v1127_v8 }
 0x33a   :  { %v1129_v10 = vmax.bf16 %v1128_v9, %v1127_v8 }
 0x33c   :  { %1423 = vmatmul.mubr.bf16.vlgmr.msra.gmra.mrb[12].mxu1 %v1129_v10 }
 0x40f   :  { %v1235_v12 = vpop.f32.mrb[12].mxu1 }
 0x410   :  { %v1236_v13 = vadd.f32 %v1366_v11, %v1235_v12  ;;  %v1424_v14 = vpop.f32.mrb[13].mxu1 }
 0x411   :  { %v1238_v15 = vpop.f32.mrb[14].mxu1 }
 0x412   :  { %1243 = vst.msk [vmem:[%s1860_s9] sm:$0xff] %vm1242_vm1, %v1236_v13  ;;  %v1239_v16 = vadd.f32 %v1366_v11, %v1238_v15  ;;  %v1425_v17 = vpop.f32.mrb[15].mxu1 }
 0x414   :  { %1244 = vst.msk [vmem:[%s1860_s9 + $0x8] sm:$0xff] %vm1242_vm1, %v1239_v16 }
 0x415   :  { %1249 = vsyncpa [#allocation4], 1 }
 0x416   :  { %1250 = vsyncpa [#allocation6], 1 }

</bundles_post_ra>
